<compile_context>
chip_gen: v7x
topology: tpu7x:2x2x1
jax: 0.10.0
libtpu: 0.0.40
codegen_flags: <defaults>
</compile_context>

<pallas_src>
import jax
import jax.numpy as jnp
from jax.experimental import pallas as pl
from jax.experimental.pallas import tpu as pltpu


def _round_up(x, m):
    return (x + m - 1) // m * m


def _linear_kernel(x_ref, wT_ref, b_ref, o_ref):
    # y = x @ W^T + b.  o_ref (f32) is resident across the k (reduction) axis,
    # so it doubles as the accumulator: bias-init at k==0, accumulate each step.
    @pl.when(pl.program_id(2) == 0)
    def _():
        o_ref[...] = jnp.broadcast_to(b_ref[...], o_ref.shape)

    # x tile cast to bf16 in-kernel (works for f32 or bf16 inputs); bf16 x bf16
    # MXU matmul with f32 accumulation.
    o_ref[...] += jnp.dot(x_ref[...].astype(jnp.bfloat16), wT_ref[...],
                          preferred_element_type=jnp.float32)


def _linear_tile_config(K, N):
    # 256-aligned contraction/output tiles (v6e/v7x MXUs are 2x 256x256).
    tk = min(512, _round_up(K, 256))
    tn = min(512, _round_up(N, 256))
    Kp = _round_up(K, tk)
    Np = _round_up(N, tn)
    return tk, tn, Kp, Np


def prepare_linear_params(weight, bias):
    """One-time (hoisted) preprocessing of the static operands.

    weight: (N, K) in PyTorch layout, bias: (N,).
    """
    N, K = weight.shape
    tk, tn, Kp, Np = _linear_tile_config(K, N)
    wT = weight.T.astype(jnp.bfloat16)                       # (K, N)
    if (Kp, Np) != (K, N):
        wT = jnp.pad(wT, ((0, Kp - K), (0, Np - N)))
    b2d = bias.reshape(1, N).astype(jnp.float32)
    if Np != N:
        b2d = jnp.pad(b2d, ((0, 0), (0, Np - N)))
    return dict(wT=wT, b2d=b2d, bias=bias.astype(jnp.float32),
                K=K, N=N, Kp=Kp, Np=Np, tk=tk, tn=tn)


def pallas_linear(x2d, p, *, tm=512):
    """x2d: (M, K); p: output of prepare_linear_params."""
    M, K = x2d.shape
    assert K == p["K"]
    N = p["N"]

    # Tiny problems: fixed pallas_call / per-step overhead dominates — use a
    # plain fused dot with the SAME numerics (bf16 inputs, f32 accumulate).
    if M < 64 or K < 256 or N < 256:
        y = jnp.dot(x2d.astype(jnp.bfloat16), p["wT"][:K, :N],
                    preferred_element_type=jnp.float32) + p["bias"]
        return y.astype(x2d.dtype)

    tk, tn, Kp, Np = p["tk"], p["tn"], p["Kp"], p["Np"]
    tm = min(tm, _round_up(M, 16))          # 16: bf16 packs two rows/sublane
    Mp = _round_up(M, tm)

    # Keep >= 2 parallel (M,N) tiles so both v7x TensorCores get work.
    if (Mp // tm) * (Np // tn) < 2 and tn % 512 == 0:
        tn //= 2                            # still divides Np, still 256-mult
    n_streams = Np // tn                    # times the x panel is re-read

    x_in = x2d
    if (Mp, Kp) != (M, K):
        # Single fused pad (+bf16 cast so the padded copy is half the bytes).
        x_in = jnp.pad(x2d.astype(jnp.bfloat16), ((0, Mp - M), (0, Kp - K)))
    elif n_streams > 2 and x2d.dtype.itemsize > 2:
        # x is re-streamed many times: one up-front bf16 pass is cheaper than
        # reading f32 tiles n_streams times.
        x_in = x2d.astype(jnp.bfloat16)
    # else: pass x unchanged; the kernel casts each tile to bf16 on the fly
    #       (no extra HBM round trip over the activations).

    bytes_accessed = (Mp * Kp * x_in.dtype.itemsize * n_streams   # x panels
                      + Kp * Np * 2 * (Mp // tm)                  # bf16 weight
                      + Mp * Np * 4)                              # f32 output

    out = pl.pallas_call(
        _linear_kernel,
        out_shape=jax.ShapeDtypeStruct((Mp, Np), jnp.float32),
        grid_spec=pltpu.PrefetchScalarGridSpec(
            num_scalar_prefetch=0,
            grid=(Mp // tm, Np // tn, Kp // tk),      # reduction axis last
            in_specs=[
                pl.BlockSpec((tm, tk), lambda i, j, k: (i, k)),
                pl.BlockSpec((tk, tn), lambda i, j, k: (k, j)),
                pl.BlockSpec((1, tn), lambda i, j, k: (0, j)),
            ],
            out_specs=pl.BlockSpec((tm, tn), lambda i, j, k: (i, j)),
        ),
        compiler_params=pltpu.CompilerParams(
            dimension_semantics=("parallel", "parallel", "arbitrary"),
            vmem_limit_bytes=48 * 1024 * 1024,        # leaves headroom on v7x
        ),
        cost_estimate=pl.CostEstimate(
            flops=2 * Mp * Np * Kp,
            transcendentals=0,
            bytes_accessed=bytes_accessed,
        ),
    )(x_in, p["wT"], p["b2d"])

    if (Mp, Np) != (M, N):
        out = out[:M, :N]
    return out.astype(x2d.dtype)


class PallasLinearTrainer:
    """Concrete deterministic 'trainer': a single Linear(hidden, hidden)."""

    def __init__(self, hidden, key):
        kw, kb = jax.random.split(key)
        bound = 1.0 / (hidden ** 0.5)
        self.weight = jax.random.uniform(kw, (hidden, hidden),
                                         jnp.float32, -bound, bound)
        self.bias = jax.random.uniform(kb, (hidden,),
                                       jnp.float32, -bound, bound)
        # Transpose / bf16 cast / pad / bias prep done ONCE, not per call.
        self.params = prepare_linear_params(self.weight, self.bias)

    def __call__(self, x):
        B, S, H = x.shape
        y2d = pallas_linear(x.reshape(B * S, H), self.params)
        return y2d.reshape(B, S, H)


class TrainerAsModule:
    """Faithful port of the PyTorch wrapper: forward(x) = trainer(x)."""

    def __init__(self, trainer):
        self.trainer = trainer

    def __call__(self, in_tensor):
        return self.trainer(in_tensor)


if __name__ == "__main__":
    key = jax.random.PRNGKey(0)
    k_x, k_p = jax.random.split(key)

    # Small demo shape that still exercises the Pallas path (M=128 rows,
    # hidden=512 -> grid (1, 2, 1): bias-init at k==0 and a parallel N axis).
    batch, seq, hidden = 2, 64, 512
    x = jax.random.normal(k_x, (batch, seq, hidden), jnp.float32)

    trainer = PallasLinearTrainer(hidden, k_p)
    module = TrainerAsModule(trainer)

    out = jax.block_until_ready(module(x))

    # Reference with identical bf16 inputs / f32 accumulation.
    ref = (jnp.dot(x.reshape(-1, hidden).astype(jnp.bfloat16),
                   trainer.params["wT"][:hidden, :hidden],
                   preferred_element_type=jnp.float32)
           + trainer.bias).reshape(batch, seq, hidden)

    assert out.shape == (batch, seq, hidden)
    assert jnp.allclose(out, ref, atol=2e-3, rtol=2e-3)

    print("KERNEL_OK")
</pallas_src>

<mosaic_0001>
module attributes {stable_mosaic.version = 11 : i64} {
  func.func @_linear_kernel(%arg0: i32, %arg1: i32, %arg2: i32, %arg3: memref<128x512xf32, #tpu.memory_space<vmem>>, %arg4: memref<512x256xbf16, #tpu.memory_space<vmem>>, %arg5: memref<1x256xf32, #tpu.memory_space<vmem>>, %arg6: memref<128x256xf32, #tpu.memory_space<vmem>>) attributes {dimension_semantics = [#tpu.dimension_semantics<parallel>, #tpu.dimension_semantics<parallel>, #tpu.dimension_semantics<arbitrary>], iteration_bounds = array<i64: 1, 2, 1>, scalar_prefetch = 0 : i64, scratch_operands = 0 : i64, tpu.core_type = #tpu.core_type<tc>, window_params = [{transform_indices = @transform_0, window_bounds = array<i64: 128, 512>}, {transform_indices = @transform_1, window_bounds = array<i64: 512, 256>}, {transform_indices = @transform_2, window_bounds = array<i64: 1, 256>}, {transform_indices = @transform_3, window_bounds = array<i64: 128, 256>}]} {
    %c0_i32 = arith.constant 0 : i32
    %0 = arith.cmpi eq, %arg2, %c0_i32 : i32
    %1 = arith.extui %0 : i1 to i32
    %c0_i32_0 = arith.constant 0 : i32
    %2 = arith.cmpi ne, %1, %c0_i32_0 : i32
    scf.if %2 {
      %c0_8 = arith.constant 0 : index
      %c0_9 = arith.constant 0 : index
      %10 = vector.load %arg5[%c0_8, %c0_9] : memref<1x256xf32, #tpu.memory_space<vmem>>, vector<1x256xf32>
      %11 = vector.shape_cast %10 : vector<1x256xf32> to vector<1x256xf32>
      %12 = vector.broadcast %11 : vector<1x256xf32> to vector<128x256xf32>
      %c0_10 = arith.constant 0 : index
      %c0_11 = arith.constant 0 : index
      %13 = vector.load %arg6[%c0_10, %c0_11] : memref<128x256xf32, #tpu.memory_space<vmem>>, vector<128x256xf32>
      tpu.vector_store %arg6[%c0_10, %c0_11], %12 {strides = array<i32>} : memref<128x256xf32, #tpu.memory_space<vmem>>, vector<128x256xf32>,
    } else {
    }
    %c0 = arith.constant 0 : index
    %c0_1 = arith.constant 0 : index
    %3 = vector.load %arg6[%c0, %c0_1] : memref<128x256xf32, #tpu.memory_space<vmem>>, vector<128x256xf32>
    %c0_2 = arith.constant 0 : index
    %c0_3 = arith.constant 0 : index
    %4 = vector.load %arg3[%c0_2, %c0_3] : memref<128x512xf32, #tpu.memory_space<vmem>>, vector<128x512xf32>
    %5 = arith.truncf %4 : vector<128x512xf32> to vector<128x512xbf16>
    %c0_4 = arith.constant 0 : index
    %c0_5 = arith.constant 0 : index
    %6 = vector.load %arg4[%c0_4, %c0_5] : memref<512x256xbf16, #tpu.memory_space<vmem>>, vector<512x256xbf16>
    %cst = arith.constant dense<0.000000e+00> : vector<128x256xf32>
    %7 = tpu.matmul %5, %6, %cst {dimension_numbers = #tpu.dot_dimension_numbers<[1], [0], [0], [1], [0, 0, 1, 1], [], []>} : vector<128x512xbf16>, vector<512x256xbf16>, vector<128x256xf32> -> vector<128x256xf32>
    %8 = arith.addf %3, %7 : vector<128x256xf32>
    %c0_6 = arith.constant 0 : index
    %c0_7 = arith.constant 0 : index
    %9 = vector.load %arg6[%c0_6, %c0_7] : memref<128x256xf32, #tpu.memory_space<vmem>>, vector<128x256xf32>
    tpu.vector_store %arg6[%c0_6, %c0_7], %8 {strides = array<i32>} : memref<128x256xf32, #tpu.memory_space<vmem>>, vector<128x256xf32>,
    return
  }
  func.func @transform_0(%arg0: i32, %arg1: i32, %arg2: i32) -> (i32, i32) {
    %c0_i32 = arith.constant 0 : i32
    return %arg0, %arg2 : i32, i32
  }
  func.func @transform_1(%arg0: i32, %arg1: i32, %arg2: i32) -> (i32, i32) {
    %c0_i32 = arith.constant 0 : i32
    return %arg2, %arg1 : i32, i32
  }
  func.func @transform_2(%arg0: i32, %arg1: i32, %arg2: i32) -> (i32, i32) {
    %c0_i32 = arith.constant 0 : i32
    %c0_i32_0 = arith.constant 0 : i32
    return %c0_i32, %arg1 : i32, i32
  }
  func.func @transform_3(%arg0: i32, %arg1: i32, %arg2: i32) -> (i32, i32) {
    %c0_i32 = arith.constant 0 : i32
    return %arg0, %arg1 : i32, i32
  }
}

</mosaic_0001>

<bundles_post_ra>
// kernel: tpu_custom_call.1
= control target key start
LH: loop header
LB: loop body
LE: loop exit
PB: predicated region body
PF: predicated region fallthrough
CT: control target
= control target key end

     0   :  { %8 = vsyncpa [#allocation3], 0  ;;  %s2083_s0 = inlined_call_operand.hbm [shape: f32[128,512], index: 0, kind: input, shape index: {}]   ;;  %s2084_s1 = inlined_call_operand.hbm [shape: bf16[512,512], index: 1, kind: input, shape index: {}]   ;;  %s2085_s2 = inlined_call_operand.vmem [shape: f32[1,512], index: 2, kind: input, shape index: {}]   ;;  %s2086_s3 = inlined_call_operand.hbm [shape: f32[128,512], index: 3, kind: output, shape index: {}]  }
   0x1   :  { %9 = vsyncpa [#allocation6], 0 }
   0x2   :  { %11 = vsyncpa [#allocation6 + $0x1], 0 }
   0x3   :  { %12 = vsyncpa [#allocation4], 0 }
   0x4   :  { %14 = vsyncpa [#allocation4 + $0x1], 0  ;;  %s1721_s12 = smov 0   ;;  %s1723_s13 = smov 0  }
   0x5   :  { %s1725_s14 = smov 0   ;;  %s1727_s15 = smov 0  }
   0x6   :  { %s1729_s16 = smov 0   ;;  %s1731_s17 = smov 0  }
   0x7 LB: > { %s1251_s18 = sadd.s32 4294967295, %s1688_s17   ;;  %s1252_s19 = sadd.s32 4294967294, %s1688_s17   ;;  %s1688_s17 = sphi %s1731_s17, %s20_s17   ;;  %s1684_s16 = sphi %s1729_s16, %s2112_s16   ;;  %s1680_s15 = sphi %s1727_s15, %s2111_s15   ;;  %s1676_s14 = sphi %s1725_s14, %s2110_s14   ;;  %s1672_s13 = sphi %s1723_s13, %s2109_s13   ;;  %s1668_s12 = sphi %s1721_s12, %s2108_s12  }
   0x8   : > { %p83_p0 = scmp.ne.s32.totalorder %s1676_s14, %s1672_s13  ;;  %p84_p1 = scmp.eq.s32.totalorder %s1688_s17, 0 }
   0x9   : > { %p89_p2 = scmp.ne.s32.totalorder %s1672_s13, %s1668_s12  ;;  %p1758_p3 = scmp.eq.s32.totalorder %s1251_s18, 0 }
   0xa   : > { %p1762_p4 = por %p84_p1, %p83_p0  ;;  %p141_p5 = scmp.eq.s32.totalorder %s1251_s18, 1 }
   0xb   : > { %s2093_s20 = scalar_select %p1758_p3, 1, 0 }
   0xc   : > { %p1768_p6 = por %p1758_p3, %p89_p2  ;;  %p147_p7 = scmp.eq.s32.totalorder %s1252_s19, 1 }
   0xd   : > { %p1772_p8 = por %p141_p5, %p83_p0  ;;  %p1253_p9 = scmp.ge.s32.totalorder %s1688_s17, 1 }
   0xe   : > { %s2095_s22 = scalar_select %p1768_p6, 1, 0 }
   0xf   : > { %s2096_s23 = scalar_select %p1772_p8, 1, 0 }
  0x10   : > { %p1777_p10 = por %p147_p7, %p89_p2  ;;  %p154_p11 = scmp.lt.s32.totalorder %s1688_s17, 3 }
  0x11   : > { %s1690_s26 = smov [#allocation2]   ;;  %p1388_p1 = scmp.lt.s32.totalorder %s1688_s17, 2 }
  0x12   : > { %s2097_s24 = scalar_select %p1777_p10, 1, 0 }
  0x13   : > { %p1782_p12 = pnand %p1253_p9, %p154_p11  ;;  %s172_s27 = sshll.u32 %s1690_s26, 4  ;;  %s1786_s27 = int_to_ptr.vmem [resolvable:$true] %s172_s27 }
  0x14   : > { %p1800_p2 = pnand %p1388_p1, %p1762_p4  ;;  %s35_s30 = sadd.s32 1, %s1684_s16 }
  0x15   : > { %s2098_s25 = scalar_select %p1782_p12, 1, 0 }
  0x16   : > { %p1375_p13 = pneg %p1782_p12  ;;  %s1544_s6 = scalar_lea.hbm %s2083_s0, 8192 }
  0x17   : > { %s2100_s29 = scalar_select %p1800_p2, 1, 0 }
  0x18   : > { %p1794_p5 = pnand %p1375_p13, %p1758_p3  ;;  %p1545_p7 = scmp.ne.s32.totalorder %s2083_s0, %s1544_s6 }
  0x19   : > { %p1551_p4 = scmp.lt.u32.totalorder %s1544_s6, %s2083_s0 }
  0x1a   : > { %p1546_p9 = pneg %p1794_p5 }
  0x1c   : > { %p1547_p11 = pnand %p1546_p9, %p1545_p7 }
  0x1e   : > { %p1548_p13 = pneg %p1547_p11 }
  0x20   : > { %p1553_p1 = pnand %p1551_p4, %p1548_p13 }
  0x22   : > { %1556 = shalt.err (!%p1553_p1)
}
  0x23   : > { %s1557_s11 = scalar_lea.vmem %s1786_s27, 8192  ;;  %p1565_p6 = scmp.lt.s32.totalorder %s1786_s27, %s1786_s27 }
  0x24   : > { %p1558_p0 = scmp.ne.s32.totalorder %s1786_s27, %s1557_s11  ;;  %p1566_p3 = scmp.lt.s32.totalorder %s1557_s11, %s1557_s11 }
  0x26   : > { %p1560_p10 = pnand %p1558_p0, %p1546_p9  ;;  %p1567_p12 = por %p1566_p3, %p1565_p6 }
  0x28   : > { %p1561_p8 = pneg %p1560_p10 }
  0x2a   : > { %p1568_p2 = pnand %p1567_p12, %p1561_p8 }
  0x2c   : > { %1571 = shalt.err (!%p1568_p2)
}
  0x2d   : > { %s1691_s18 = smov 512   ;;  %s1692_s19 = smov 32  }
  0x2e   : > { %1378 = dma.hbm_to_vmem [thread:$0]  (!%p1794_p5), %s2083_s0, 8192, %s1786_s27, [#allocation3], %s1691_s18, %s1691_s18, %s1692_s19  }
  0x2f   : > { %p37_p10 = scmp.ge.s32.totalorder %s35_s30, 2  ;;  %s76_s4 = sadd.s32 1, %s1676_s14 }
  0x30   : > { %s186_s5 = sand.u32 1, %s1676_s14   ;;  %s1333_s8 = sshll.u32 %s1684_s16, 7 }
  0x31   : > { %s2114_s30 = smov (%p37_p10, %s35_s30), 0  ;;  %s1256_s6 = sshll.u32 %s186_s5, 9 }
  0x32   : > { %s72_s7 = ssub.s32 %s1684_s16, %s2114_s30  ;;  %s1836_s28 = scalar_lea.hbm %s2084_s1, %s1333_s8 }
  0x33   : > { %p74_p3 = scmp.eq.s32.totalorder %s72_s7, 0  ;;  %s190_s27 = scalar_lea.vmem [#allocation5], %s1256_s6 }
  0x34   : > { %s200_s11 = sshll.u32 %s190_s27, 4  ;;  %s1843_s19 = scalar_lea.sflag [#allocation6], %s186_s5  ;;  %s1841_s11 = int_to_ptr.vmem [resolvable:$true] %s200_s11 }
  0x35   : > { %s1839_s18 = scalar_select %p74_p3, %s1676_s14, %s76_s4  }
  0x36   : > { %s1572_s21 = scalar_lea.hbm %s1836_s28, 8192  ;;  %p2101_p8 = scmp.ne.s32.totalorder %s2100_s29, 0 }
  0x37   : > { %p1573_p6 = scmp.ne.s32.totalorder %s1836_s28, %s1572_s21  ;;  %s1577_s8 = scalar_lea.hbm %s2084_s1, 16384 }
  0x38   : > { %p1574_p12 = pneg %p2101_p8  ;;  %p1578_p2 = scmp.lt.u32.totalorder %s1836_s28, %s2084_s1 }
  0x39   : > { %p1579_p7 = scmp.lt.u32.totalorder %s1577_s8, %s1572_s21  ;;  %p1581_p11 = scmp.lt.u32.totalorder %s1572_s21, %s1836_s28 }
  0x3a   : > { %p1575_p0 = pnand %p1574_p12, %p1573_p6 }
  0x3b   : > { %p1580_p9 = por %p1579_p7, %p1578_p2 }
  0x3c   : > { %p1576_p5 = pneg %p1575_p0 }
  0x3d   : > { %p1582_p13 = por %p1581_p11, %p1580_p9 }
  0x3f   : > { %p1583_p4 = pnand %p1582_p13, %p1576_p5 }
  0x41   : > { %1586 = shalt.err (!%p1583_p4)
}
  0x42   : > { %s1587_s4 = scalar_lea.vmem %s1841_s11, 8192  ;;  %s1693_s5 = smov [#allocation5]  }
  0x43   : > { %p1588_p1 = scmp.ne.s32.totalorder %s1841_s11, %s1587_s4  ;;  %s1592_s10 = sshll.u32 %s1693_s5, 4  ;;  %s1593_s10 = int_to_ptr.vmem [resolvable:$false] %s1592_s10 }
  0x44   : > { %s1594_s27 = scalar_lea.vmem %s1593_s10, 16384  ;;  %p1595_p6 = scmp.lt.s32.totalorder %s1841_s11, %s1593_s10 }
  0x45   : > { %p1590_p10 = pnand %p1588_p1, %p1574_p12  ;;  %p1596_p0 = scmp.lt.s32.totalorder %s1594_s27, %s1587_s4 }
  0x47   : > { %p1591_p3 = pneg %p1590_p10  ;;  %p1597_p2 = por %p1596_p0, %p1595_p6 }
  0x49   : > { %p1598_p7 = pnand %p1597_p2, %p1591_p3 }
  0x4b   : > { %1601 = shalt.err (!%p1598_p7)
}
  0x4c   : > { %s1694_s21 = smov 256   ;;  %s1695_s26 = smov 128  }
  0x4d   : > { %s1696_s7 = smov 8   ;;  %p2102_p12 = scmp.ne.s32.totalorder %s2098_s25, 0 }
  0x4e   : > { %1382 = dma.hbm_to_vmem [thread:$0]  (!%p2101_p8), %s1836_s28, 8192, %s1841_s11, %s1843_s19, %s1694_s21, %s1695_s26, %s1696_s7  }
  0x4f   : > { %220 = sbr.rel (%p2102_p12) target bundleno = 448 (0x1c0), region = 32  ;;  %p2103_p5 = scmp.ne.s32.totalorder (!%p2102_p12), %s2093_s20, 0 }
  0x56   : > { %1655 = dma.done.wait (%p2103_p5), [#allocation3], 8192  }
  0x57   : > { %1657 = vsyncadd (%p2103_p5), [#allocation3], 4294959104  ;;  %s1878_s8 = sand.u32 1, %s1672_s13   ;;  %p2104_p8 = scmp.ne.s32.totalorder %s2095_s22, 0 }
  0x58   : > { %s1261_s6 = sshll.u32 %s1878_s8, 9  ;;  %s227_s9 = scalar_lea.sflag [#allocation6], %s1878_s8 }
  0x59   : > { %s1882_s4 = scalar_lea.vmem [#allocation5], %s1261_s6 }
  0x5a   : > { %1659 = dma.done.wait (%p2104_p8), %s227_s9, 8192  }
  0x5b   : > { %1661 = vsyncadd (%p2104_p8), %s227_s9, 4294959104  ;;  %v1448_v0 = vld [vmem:[%s1882_s4 + $0x4] ss:$8 sps:$4 sm:$0xff]   ;;  %v1452_v2 = vld [vmem:[%s1882_s4] ss:$8 sps:$4 sm:$0xff]   ;;  %s1263_s20 = sshll.u32 %s1680_s15, 1 }
  0x5c   : > { %v1450_v1 = vld [vmem:[%s1882_s4 + $0x104] ss:$8 sps:$4 sm:$0xff]   ;;  %828 = vmatprep.subr.bf16.mxu1 %v1448_v0  ;;  %v1453_v3 = vld [vmem:[%s1882_s4 + $0x100] ss:$8 sps:$4 sm:$0xff]   ;;  %v1454_v4 = vld [vmem:[%s1882_s4 + $0x14] ss:$8 sps:$4 sm:$0xff]  }
  0x5d   : > { %941 = vmatprep.subr.bf16.mxu0 %v1450_v1  ;;  %829 = vmatpush1.bf16.msra.mxu1 %v1452_v2  ;;  %v1456_v5 = vld [vmem:[%s1882_s4 + $0x114] ss:$8 sps:$4 sm:$0xff]   ;;  %v1458_v6 = vld [vmem:[%s1882_s4 + $0x10] ss:$8 sps:$4 sm:$0xff]   ;;  %v1460_v8 = vld [vmem:[%s1882_s4 + $0x24] ss:$8 sps:$4 sm:$0xff]  }
  0x5e   : > { %942 = vmatpush1.bf16.msra.mxu0 %v1453_v3  ;;  %830 = vmatprep.subr.bf16.mxu1 %v1454_v4  ;;  %v1459_v7 = vld [vmem:[%s1882_s4 + $0x110] ss:$8 sps:$4 sm:$0xff]   ;;  %v1462_v9 = vld [vmem:[%s1882_s4 + $0x124] ss:$8 sps:$4 sm:$0xff]   ;;  %v1464_v10 = vld [vmem:[%s1882_s4 + $0x20] ss:$8 sps:$4 sm:$0xff]  }
  0x5f   : > { %943 = vmatprep.subr.bf16.mxu0 %v1456_v5  ;;  %v1465_v11 = vld [vmem:[%s1882_s4 + $0x120] ss:$8 sps:$4 sm:$0xff]   ;;  %v1466_v12 = vld [vmem:[%s1882_s4 + $0x34] ss:$8 sps:$4 sm:$0xff]   ;;  %v1470_v14 = vld [vmem:[%s1882_s4 + $0x30] ss:$8 sps:$4 sm:$0xff]  }
  0x60   : > { %v1468_v13 = vld [vmem:[%s1882_s4 + $0x134] ss:$8 sps:$4 sm:$0xff]   ;;  %v1471_v15 = vld [vmem:[%s1882_s4 + $0x130] ss:$8 sps:$4 sm:$0xff]   ;;  %v1472_v16 = vld [vmem:[%s1882_s4 + $0x44] ss:$8 sps:$4 sm:$0xff]  }
  0x61   : > { %831 = vmatpush1.bf16.msra.mxu1 %v1458_v6  ;;  %v1474_v17 = vld [vmem:[%s1882_s4 + $0x144] ss:$8 sps:$4 sm:$0xff]   ;;  %v1476_v18 = vld [vmem:[%s1882_s4 + $0x40] ss:$8 sps:$4 sm:$0xff]   ;;  %v1478_v20 = vld [vmem:[%s1882_s4 + $0x54] ss:$8 sps:$4 sm:$0xff]  }
  0x62   : > { %944 = vmatpush1.bf16.msra.mxu0 %v1459_v7  ;;  %832 = vmatprep.subr.bf16.mxu1 %v1460_v8  ;;  %v1477_v19 = vld [vmem:[%s1882_s4 + $0x140] ss:$8 sps:$4 sm:$0xff]   ;;  %v1480_v21 = vld [vmem:[%s1882_s4 + $0x154] ss:$8 sps:$4 sm:$0xff]   ;;  %v1482_v22 = vld [vmem:[%s1882_s4 + $0x50] ss:$8 sps:$4 sm:$0xff]  }
  0x63   : > { %945 = vmatprep.subr.bf16.mxu0 %v1462_v9  ;;  %v1483_v23 = vld [vmem:[%s1882_s4 + $0x150] ss:$8 sps:$4 sm:$0xff]   ;;  %v1484_v24 = vld [vmem:[%s1882_s4 + $0x64] ss:$8 sps:$4 sm:$0xff]   ;;  %v1488_v26 = vld [vmem:[%s1882_s4 + $0x60] ss:$8 sps:$4 sm:$0xff]  }
  0x64   : > { %v1486_v25 = vld [vmem:[%s1882_s4 + $0x164] ss:$8 sps:$4 sm:$0xff]   ;;  %v1489_v27 = vld [vmem:[%s1882_s4 + $0x160] ss:$8 sps:$4 sm:$0xff]   ;;  %v1490_v28 = vld [vmem:[%s1882_s4 + $0x74] ss:$8 sps:$4 sm:$0xff]  }
  0x65   : > { %833 = vmatpush1.bf16.msra.mxu1 %v1464_v10  ;;  %v1492_v29 = vld [vmem:[%s1882_s4 + $0x174] ss:$8 sps:$4 sm:$0xff]   ;;  %v1494_v30 = vld [vmem:[%s1882_s4 + $0x70] ss:$8 sps:$4 sm:$0xff]   ;;  %v1496_v32 = vld [vmem:[%s1882_s4 + $0x84] ss:$8 sps:$4 sm:$0xff]  }
  0x66   : > { %946 = vmatpush1.bf16.msra.mxu0 %v1465_v11  ;;  %834 = vmatprep.subr.bf16.mxu1 %v1466_v12  ;;  %v1495_v31 = vld [vmem:[%s1882_s4 + $0x170] ss:$8 sps:$4 sm:$0xff]   ;;  %v1498_v33 = vld [vmem:[%s1882_s4 + $0x184] ss:$8 sps:$4 sm:$0xff]   ;;  %v1500_v34 = vld [vmem:[%s1882_s4 + $0x80] ss:$8 sps:$4 sm:$0xff]  }
  0x67   : > { %947 = vmatprep.subr.bf16.mxu0 %v1468_v13  ;;  %v1501_v35 = vld [vmem:[%s1882_s4 + $0x180] ss:$8 sps:$4 sm:$0xff]   ;;  %v1502_v36 = vld [vmem:[%s1882_s4 + $0x94] ss:$8 sps:$4 sm:$0xff]   ;;  %v1506_v38 = vld [vmem:[%s1882_s4 + $0x90] ss:$8 sps:$4 sm:$0xff]  }
  0x68   : > { %v1504_v37 = vld [vmem:[%s1882_s4 + $0x194] ss:$8 sps:$4 sm:$0xff]   ;;  %v1507_v39 = vld [vmem:[%s1882_s4 + $0x190] ss:$8 sps:$4 sm:$0xff]   ;;  %v1508_v40 = vld [vmem:[%s1882_s4 + $0xa4] ss:$8 sps:$4 sm:$0xff]  }
  0x69   : > { %835 = vmatpush1.bf16.msra.mxu1 %v1470_v14  ;;  %v1510_v41 = vld [vmem:[%s1882_s4 + $0x1a4] ss:$8 sps:$4 sm:$0xff]   ;;  %v1512_v42 = vld [vmem:[%s1882_s4 + $0xa0] ss:$8 sps:$4 sm:$0xff]   ;;  %v1514_v44 = vld [vmem:[%s1882_s4 + $0xb4] ss:$8 sps:$4 sm:$0xff]  }
  0x6a   : > { %948 = vmatpush1.bf16.msra.mxu0 %v1471_v15  ;;  %836 = vmatprep.subr.bf16.mxu1 %v1472_v16  ;;  %v1513_v43 = vld [vmem:[%s1882_s4 + $0x1a0] ss:$8 sps:$4 sm:$0xff]   ;;  %v1516_v45 = vld [vmem:[%s1882_s4 + $0x1b4] ss:$8 sps:$4 sm:$0xff]   ;;  %v1518_v50 = vld [vmem:[%s1882_s4 + $0xb0] ss:$8 sps:$4 sm:$0xff]  }
  0x6b   : > { %949 = vmatprep.subr.bf16.mxu0 %v1474_v17  ;;  %v349_v46 = vld [vmem:[#allocation2 + $0x8] sm:$0xff]  ;;  %v351_v48 = vld [vmem:[#allocation2 + $0x18] sm:$0xff]  ;;  %v348_v6 = vld [vmem:[#allocation2] sm:$0xff]  ;;  %p262_p9 = scmp.lt.s32.totalorder %s1263_s20, 3  ;;  %s1262_s28 = sshll.u32 %s1878_s8, 8 }
  0x6c   : > { %v353_v47 = vld [vmem:[#allocation2 + $0x28] sm:$0xff]  ;;  %v355_v49 = vld [vmem:[#allocation2 + $0x38] sm:$0xff]  ;;  %v352_v7 = vld [vmem:[#allocation2 + $0x20] sm:$0xff]  ;;  %s1963_s11 = scalar_lea.vmem [#allocation7], %s1262_s28  ;;  %s1334_s19 = sshll.u32 %s1680_s15, 8 }
  0x6d   : > { %837 = vmatpush1.bf16.msra.mxu1 %v1476_v18  ;;  %v1519_v51 = vld [vmem:[%s1882_s4 + $0x1b0] ss:$8 sps:$4 sm:$0xff]   ;;  %v413_v52 = vpack.c.bf16 %v353_v47, %v349_v46  ;;  %v415_v53 = vpack.c.bf16 %v355_v49, %v351_v48  ;;  %v1520_v54 = vld [vmem:[%s1882_s4 + $0xc4] ss:$8 sps:$4 sm:$0xff]   ;;  %v1524_v56 = vld [vmem:[%s1882_s4 + $0xc0] ss:$8 sps:$4 sm:$0xff]   ;;  %v412_v14 = vpack.c.bf16 %v352_v7, %v348_v6  ;;  %s2026_s15 = scalar_lea.hbm %s2086_s3, %s1334_s19 }
  0x6e   : > { %950 = vmatpush1.bf16.msra.mxu0 %v1477_v19  ;;  %838 = vmatprep.subr.bf16.mxu1 %v1478_v20  ;;  %v1522_v55 = vld [vmem:[%s1882_s4 + $0x1c4] ss:$8 sps:$4 sm:$0xff]   ;;  %v1525_v57 = vld [vmem:[%s1882_s4 + $0x1c0] ss:$8 sps:$4 sm:$0xff]   ;;  %v1526_v58 = vld [vmem:[%s1882_s4 + $0xd4] ss:$8 sps:$4 sm:$0xff]  }
  0x6f   : > { %951 = vmatprep.subr.bf16.mxu0 %v1480_v21  ;;  %860 = vmatprep.mubr.bf16.mxu1 %v413_v52  ;;  %v1528_v59 = vld [vmem:[%s1882_s4 + $0x1d4] ss:$8 sps:$4 sm:$0xff]   ;;  %v1530_v60 = vld [vmem:[%s1882_s4 + $0xd0] ss:$8 sps:$4 sm:$0xff]   ;;  %v1532_v62 = vld [vmem:[%s1882_s4 + $0xe4] ss:$8 sps:$4 sm:$0xff]  }
  0x70   : > { %973 = vmatprep.mubr.bf16.mxu0 %v415_v53  ;;  %v1531_v61 = vld [vmem:[%s1882_s4 + $0x1d0] ss:$8 sps:$4 sm:$0xff]   ;;  %v1534_v63 = vld [vmem:[%s1882_s4 + $0x1e4] ss:$8 sps:$4 sm:$0xff]   ;;  %v1536_v0 = vld [vmem:[%s1882_s4 + $0xe0] ss:$8 sps:$4 sm:$0xff]  }
  0x71   : > { %839 = vmatpush1.bf16.msra.mxu1 %v1482_v22  ;;  %v1537_v1 = vld [vmem:[%s1882_s4 + $0x1e0] ss:$8 sps:$4 sm:$0xff]   ;;  %v1538_v2 = vld [vmem:[%s1882_s4 + $0xf4] ss:$8 sps:$4 sm:$0xff]   ;;  %v1542_v4 = vld [vmem:[%s1882_s4 + $0xf0] ss:$8 sps:$4 sm:$0xff]  }
  0x72   : > { %952 = vmatpush1.bf16.msra.mxu0 %v1483_v23  ;;  %840 = vmatprep.subr.bf16.mxu1 %v1484_v24  ;;  %v1540_v3 = vld [vmem:[%s1882_s4 + $0x1f4] ss:$8 sps:$4 sm:$0xff]   ;;  %v1543_v5 = vld [vmem:[%s1882_s4 + $0x1f0] ss:$8 sps:$4 sm:$0xff]   ;;  %v357_v10 = vld [vmem:[#allocation2 + $0x48] sm:$0xff]  ;;  %s2116_s20 = smov (!%p262_p9, %s1263_s20), 3 }
  0x73   : > { %953 = vmatprep.subr.bf16.mxu0 %v1486_v25  ;;  %v350_v8 = vld [vmem:[#allocation2 + $0x10] sm:$0xff]  ;;  %v361_v11 = vld [vmem:[#allocation2 + $0x68] sm:$0xff]  ;;  %v359_v12 = vld [vmem:[#allocation2 + $0x58] sm:$0xff]  ;;  %s264_s29 = scalar_lea.vmem %s2085_s2, %s2116_s20  ;;  %s1135_s5 = sshll.u32 %s1963_s11, 4  ;;  %s2030_s5 = int_to_ptr.vmem [resolvable:$true] %s1135_s5 }
  0x74   : > { %v354_v9 = vld [vmem:[#allocation2 + $0x30] sm:$0xff]  ;;  %v363_v13 = vld [vmem:[#allocation2 + $0x78] sm:$0xff]  ;;  %v417_v16 = vpack.c.bf16 %v361_v11, %v357_v10  ;;  %v356_v18 = vld [vmem:[#allocation2 + $0x40] sm:$0xff]  ;;  %s1119_s21 = scalar_lea.sflag [#allocation4], %s1878_s8  ;;  %s1602_s26 = scalar_lea.vmem %s2030_s5, 4096 }
  0x75   : > { %841 = vmatpush1.bf16.msra.mxu1 %v1488_v26  ;;  %v414_v15 = vpack.c.bf16 %v354_v9, %v350_v8  ;;  %v419_v17 = vpack.c.bf16 %v363_v13, %v359_v12  ;;  %v360_v19 = vld [vmem:[#allocation2 + $0x60] sm:$0xff]  ;;  %v358_v20 = vld [vmem:[#allocation2 + $0x50] sm:$0xff]  ;;  %v365_v22 = vld [vmem:[#allocation2 + $0x88] sm:$0xff]  ;;  %p1603_p11 = scmp.ne.s32.totalorder %s2030_s5, %s1602_s26  ;;  %p2105_p13 = scmp.ne.s32.totalorder %s2096_s23, 0 }
  0x76   : > { %954 = vmatpush1.bf16.msra.mxu0 %v1489_v27  ;;  %842 = vmatprep.subr.bf16.mxu1 %v1490_v28  ;;  %v362_v21 = vld [vmem:[#allocation2 + $0x70] sm:$0xff]  ;;  %v369_v23 = vld [vmem:[#allocation2 + $0xa8] sm:$0xff]  ;;  %v367_v24 = vld [vmem:[#allocation2 + $0x98] sm:$0xff]  ;;  %v416_v26 = vpack.c.bf16 %v360_v19, %v356_v18  ;;  %s1697_s7 = smov [#allocation7]  }
  0x77   : > { %955 = vmatprep.subr.bf16.mxu0 %v1492_v29  ;;  %v371_v25 = vld [vmem:[#allocation2 + $0xb8] sm:$0xff]  ;;  %v418_v27 = vpack.c.bf16 %v362_v21, %v358_v20  ;;  %v421_v28 = vpack.c.bf16 %v369_v23, %v365_v22  ;;  %v381_v46 = vld [vmem:[#allocation2 + $0x108] sm:$0xff]  ;;  %p1604_p4 = pnand %p1603_p11, %p2105_p13  ;;  %s1606_s6 = sshll.u32 %s1697_s7, 4  ;;  %s1607_s6 = int_to_ptr.vmem [resolvable:$false] %s1606_s6 }
  0x78   : > { %v423_v29 = vpack.c.bf16 %v371_v25, %v367_v24  ;;  %v385_v47 = vld [vmem:[#allocation2 + $0x128] sm:$0xff]  ;;  %v383_v48 = vld [vmem:[#allocation2 + $0x118] sm:$0xff]  ;;  %s1608_s9 = scalar_lea.vmem %s1607_s6, 8192  ;;  %p1609_p10 = scmp.lt.s32.totalorder %s2030_s5, %s1607_s6 }
  0x79   : > { %843 = vmatpush1.bf16.msra.mxu1 %v1494_v30  ;;  %v364_v30 = vld [vmem:[#allocation2 + $0x80] sm:$0xff]  ;;  %v387_v49 = vld [vmem:[#allocation2 + $0x138] sm:$0xff]  ;;  %v429_v52 = vpack.c.bf16 %v385_v47, %v381_v46  ;;  %v397_v6 = vld [vmem:[#allocation2 + $0x188] sm:$0xff]  ;;  %p1605_p1 = pneg %p1604_p4  ;;  %p1610_p3 = scmp.lt.s32.totalorder %s1608_s9, %s1602_s26 }
  0x7a   : > { %956 = vmatpush1.bf16.msra.mxu0 %v1495_v31  ;;  %844 = vmatprep.subr.bf16.mxu1 %v1496_v32  ;;  %v368_v31 = vld [vmem:[#allocation2 + $0xa0] sm:$0xff]  ;;  %v366_v32 = vld [vmem:[#allocation2 + $0x90] sm:$0xff]  ;;  %v431_v53 = vpack.c.bf16 %v387_v49, %v383_v48  ;;  %v401_v7 = vld [vmem:[#allocation2 + $0x1a8] sm:$0xff] }
  0x7b   : > { %957 = vmatprep.subr.bf16.mxu0 %v1498_v33  ;;  %v370_v33 = vld [vmem:[#allocation2 + $0xb0] sm:$0xff]  ;;  %v399_v8 = vld [vmem:[#allocation2 + $0x198] sm:$0xff]  ;;  %v437_v12 = vpack.c.bf16 %v401_v7, %v397_v6  ;;  %v405_v18 = vld [vmem:[#allocation2 + $0x1c8] sm:$0xff]  ;;  %p1611_p6 = por %p1610_p3, %p1609_p10 }
  0x7c   : > { %v403_v9 = vld [vmem:[#allocation2 + $0x1b8] sm:$0xff]  ;;  %v409_v19 = vld [vmem:[#allocation2 + $0x1e8] sm:$0xff] }
  0x7d   : > { %845 = vmatpush1.bf16.msra.mxu1 %v1500_v34  ;;  %v373_v34 = vld [vmem:[#allocation2 + $0xc8] sm:$0xff]  ;;  %v439_v13 = vpack.c.bf16 %v403_v9, %v399_v8  ;;  %v407_v20 = vld [vmem:[#allocation2 + $0x1d8] sm:$0xff]  ;;  %v441_v24 = vpack.c.bf16 %v409_v19, %v405_v18  ;;  %p1612_p0 = pnand %p1611_p6, %p1605_p1 }
  0x7e   : > { %958 = vmatpush1.bf16.msra.mxu0 %v1501_v35  ;;  %846 = vmatprep.subr.bf16.mxu1 %v1502_v36  ;;  %v377_v35 = vld [vmem:[#allocation2 + $0xe8] sm:$0xff]  ;;  %v375_v36 = vld [vmem:[#allocation2 + $0xd8] sm:$0xff] }
  0x7f   : > { %959 = vmatprep.subr.bf16.mxu0 %v1504_v37  ;;  %v379_v37 = vld [vmem:[#allocation2 + $0xf8] sm:$0xff] }
  0x80   : > { %v411_v21 = vld [vmem:[#allocation2 + $0x1f8] sm:$0xff] }
  0x81   : > { %847 = vmatpush1.bf16.msra.mxu1 %v1506_v38  ;;  %v420_v38 = vpack.c.bf16 %v368_v31, %v364_v30  ;;  %v443_v25 = vpack.c.bf16 %v411_v21, %v407_v20 }
  0x82   : > { %960 = vmatpush1.bf16.msra.mxu0 %v1507_v39  ;;  %848 = vmatprep.subr.bf16.mxu1 %v1508_v40  ;;  %v422_v39 = vpack.c.bf16 %v370_v33, %v366_v32  ;;  %v425_v40 = vpack.c.bf16 %v377_v35, %v373_v34  ;;  %v274_v32 = vlaneseq  ;;  %v272_v35 = vld [vmem:[%s264_s29] sm:$0x3] }
  0x83   : > { %961 = vmatprep.subr.bf16.mxu0 %v1510_v41  ;;  %v427_v41 = vpack.c.bf16 %v379_v37, %v375_v36 }
  0x84   : > { %v275_v33 = vshrl.u32 %v274_v32, 7 }
  0x85   : > { %849 = vmatpush1.bf16.msra.mxu1 %v1512_v42  ;;  %v372_v42 = vld [vmem:[#allocation2 + $0xc0] sm:$0xff] }
  0x86   : > { %962 = vmatpush1.bf16.msra.mxu0 %v1513_v43  ;;  %850 = vmatprep.subr.bf16.mxu1 %v1514_v44  ;;  %v376_v43 = vld [vmem:[#allocation2 + $0xe0] sm:$0xff]  ;;  %v374_v44 = vld [vmem:[#allocation2 + $0xd0] sm:$0xff]  ;;  %v276_v34 = vsub.s32 0, %v275_v33  ;;  %v280_v36 = vsub.s32 1, %v275_v33 }
  0x87   : > { %963 = vmatprep.subr.bf16.mxu0 %v1516_v45  ;;  %v378_v45 = vld [vmem:[#allocation2 + $0xf0] sm:$0xff] }
  0x88   : > { %v1957_v37 = vrot.slane %v272_v35, %v276_v34 }
  0x89   : > { %851 = vmatpush1.bf16.msra.mxu1 %v1518_v50  ;;  %v424_v50 = vpack.c.bf16 %v376_v43, %v372_v42 }
  0x8a   : > { %964 = vmatpush1.bf16.msra.mxu0 %v1519_v51  ;;  %852 = vmatprep.subr.bf16.mxu1 %v1520_v54  ;;  %v426_v51 = vpack.c.bf16 %v378_v45, %v374_v44  ;;  %v380_v54 = vld [vmem:[#allocation2 + $0x100] sm:$0xff] }
  0x8b   : > { %965 = vmatprep.subr.bf16.mxu0 %v1522_v55  ;;  %v384_v55 = vld [vmem:[#allocation2 + $0x120] sm:$0xff] }
  0x8d   : > { %853 = vmatpush1.bf16.msra.mxu1 %v1524_v56  ;;  %v382_v56 = vld [vmem:[#allocation2 + $0x110] sm:$0xff] }
  0x8e   : > { %966 = vmatpush1.bf16.msra.mxu0 %v1525_v57  ;;  %854 = vmatprep.subr.bf16.mxu1 %v1526_v58  ;;  %v386_v57 = vld [vmem:[#allocation2 + $0x130] sm:$0xff]  ;;  %v389_v58 = vld [vmem:[#allocation2 + $0x148] sm:$0xff] }
  0x8f   : > { %967 = vmatprep.subr.bf16.mxu0 %v1528_v59  ;;  %v393_v59 = vld [vmem:[#allocation2 + $0x168] sm:$0xff] }
  0x91   : > { %855 = vmatpush1.bf16.msra.mxu1 %v1530_v60  ;;  %v391_v60 = vld [vmem:[#allocation2 + $0x158] sm:$0xff] }
  0x92   : > { %968 = vmatpush1.bf16.msra.mxu0 %v1531_v61  ;;  %856 = vmatprep.subr.bf16.mxu1 %v1532_v62  ;;  %v395_v61 = vld [vmem:[#allocation2 + $0x178] sm:$0xff]  ;;  %v428_v62 = vpack.c.bf16 %v384_v55, %v380_v54 }
  0x93   : > { %969 = vmatprep.subr.bf16.mxu0 %v1534_v63  ;;  %v430_v63 = vpack.c.bf16 %v386_v57, %v382_v56 }
  0x95   : > { %857 = vmatpush1.bf16.msra.mxu1 %v1536_v0  ;;  %v433_v0 = vpack.c.bf16 %v393_v59, %v389_v58 }
  0x96   : > { %970 = vmatpush1.bf16.msra.mxu0 %v1537_v1  ;;  %858 = vmatprep.subr.bf16.mxu1 %v1538_v2  ;;  %v435_v1 = vpack.c.bf16 %v395_v61, %v391_v60  ;;  %v388_v2 = vld [vmem:[#allocation2 + $0x140] sm:$0xff] }
  0x97   : > { %971 = vmatprep.subr.bf16.mxu0 %v1540_v3  ;;  %v392_v3 = vld [vmem:[#allocation2 + $0x160] sm:$0xff] }
  0x98   : > { %v432_v10 = vpack.c.bf16 %v392_v3, %v388_v2 }
  0x99   : > { %859 = vmatpush1.bf16.msra.mxu1 %v1542_v4  ;;  %v390_v4 = vld [vmem:[#allocation2 + $0x150] sm:$0xff] }
  0x9a   : > { %972 = vmatpush1.bf16.msra.mxu0 %v1543_v5  ;;  %v394_v5 = vld [vmem:[#allocation2 + $0x170] sm:$0xff] }
  0x9b   : > { %v434_v11 = vpack.c.bf16 %v394_v5, %v390_v4 }
  0x9c   : > { %861 = vmatmul.mubr.bf16.vlgmr.msra.gmra.mrb[0].mxu1 %v412_v14  ;;  %v396_v14 = vld [vmem:[#allocation2 + $0x180] sm:$0xff] }
  0x9d   : > { %974 = vmatmul.mubr.bf16.vlgmr.msra.gmra.mrb[0].mxu0 %v414_v15  ;;  %870 = vmatprep.mubr.bf16.mxu1 %v417_v16  ;;  %v400_v15 = vld [vmem:[#allocation2 + $0x1a0] sm:$0xff]  ;;  %v398_v16 = vld [vmem:[#allocation2 + $0x190] sm:$0xff] }
  0x9e   : > { %983 = vmatprep.mubr.bf16.mxu0 %v419_v17  ;;  %v402_v17 = vld [vmem:[#allocation2 + $0x1b0] sm:$0xff]  ;;  %v436_v22 = vpack.c.bf16 %v400_v15, %v396_v14 }
  0x9f   : > { %v438_v23 = vpack.c.bf16 %v402_v17, %v398_v16 }
  0xa4   : > { %871 = vmatmul.mubr.bf16.gmra.mrb[4].mxu1 %v416_v26  ;;  %v404_v26 = vld [vmem:[#allocation2 + $0x1c0] sm:$0xff] }
  0xa5   : > { %984 = vmatmul.mubr.bf16.gmra.mrb[4].mxu0 %v418_v27  ;;  %880 = vmatprep.mubr.bf16.mxu1 %v421_v28  ;;  %v408_v27 = vld [vmem:[#allocation2 + $0x1e0] sm:$0xff]  ;;  %v406_v28 = vld [vmem:[#allocation2 + $0x1d0] sm:$0xff] }
  0xa6   : > { %993 = vmatprep.mubr.bf16.mxu0 %v423_v29  ;;  %v410_v29 = vld [vmem:[#allocation2 + $0x1f0] sm:$0xff]  ;;  %v440_v30 = vpack.c.bf16 %v408_v27, %v404_v26 }
  0xa7   : > { %v442_v31 = vpack.c.bf16 %v410_v29, %v406_v28 }
  0xac   : > { %881 = vmatmul.mubr.bf16.gmra.mrb[8].mxu1 %v420_v38 }
  0xad   : > { %994 = vmatmul.mubr.bf16.gmra.mrb[8].mxu0 %v422_v39  ;;  %890 = vmatprep.mubr.bf16.mxu1 %v425_v40  ;;  %v1959_v40 = vrot.slane %v272_v35, %v280_v36 }
  0xae   : > { %1003 = vmatprep.mubr.bf16.mxu0 %v427_v41 }
  0xb4   : > { %891 = vmatmul.mubr.bf16.gmra.mrb[12].mxu1 %v424_v50 }
  0xb5   : > { %1004 = vmatmul.mubr.bf16.gmra.mrb[12].mxu0 %v426_v51  ;;  %900 = vmatprep.mubr.bf16.mxu1 %v429_v52 }
  0xb6   : > { %1013 = vmatprep.mubr.bf16.mxu0 %v431_v53 }
  0xbc   : > { %901 = vmatmul.mubr.bf16.gmra.mrb[16].mxu1 %v428_v62 }
  0xbd   : > { %1014 = vmatmul.mubr.bf16.gmra.mrb[16].mxu0 %v430_v63  ;;  %910 = vmatprep.mubr.bf16.mxu1 %v433_v0 }
  0xbe   : > { %1023 = vmatprep.mubr.bf16.mxu0 %v435_v1 }
  0xc4   : > { %911 = vmatmul.mubr.bf16.gmra.mrb[20].mxu1 %v432_v10 }
  0xc5   : > { %1024 = vmatmul.mubr.bf16.gmra.mrb[20].mxu0 %v434_v11  ;;  %920 = vmatprep.mubr.bf16.mxu1 %v437_v12 }
  0xc6   : > { %1033 = vmatprep.mubr.bf16.mxu0 %v439_v13 }
  0xcc   : > { %921 = vmatmul.mubr.bf16.gmra.mrb[24].mxu1 %v436_v22 }
  0xcd   : > { %1034 = vmatmul.mubr.bf16.gmra.mrb[24].mxu0 %v438_v23  ;;  %930 = vmatprep.mubr.bf16.mxu1 %v441_v24 }
  0xce   : > { %1043 = vmatprep.mubr.bf16.mxu0 %v443_v25 }
  0xd4   : > { %931 = vmatmul.mubr.bf16.gmra.mrb[28].mxu1 %v440_v30 }
  0xd5   : > { %1044 = vmatmul.mubr.bf16.gmra.mrb[28].mxu0 %v442_v31 }
 0x16f   : > { %v862_v38 = vpop.f32.mrb[0].mxu1 }
 0x170   : > { %v975_v39 = vpop.f32.mrb[0].mxu0  ;;  %v864_v42 = vpop.f32.mrb[1].mxu1 }
 0x171   : > { %v976_v41 = vadd.f32 %v975_v39, %v862_v38  ;;  %v977_v43 = vpop.f32.mrb[1].mxu0  ;;  %v866_v45 = vpop.f32.mrb[2].mxu1 }
 0x172   : > { %v978_v44 = vadd.f32 %v977_v43, %v864_v42  ;;  %v979_v46 = vpop.f32.mrb[2].mxu0  ;;  %v868_v49 = vpop.f32.mrb[3].mxu1 }
 0x173   : > { %v1054_v47 = vadd.f32 %v976_v41, %v1957_v37  ;;  %v980_v48 = vadd.f32 %v979_v46, %v866_v45  ;;  %v981_v50 = vpop.f32.mrb[3].mxu0 }
 0x174   : > { %v1055_v51 = vadd.f32 %v978_v44, %v1959_v40  ;;  %v982_v52 = vadd.f32 %v981_v50, %v868_v49 }
 0x175   : > { %1086 = vst [vmem:[%s1963_s11] sm:$0xff] %v1054_v47  ;;  %v1056_v53 = vadd.f32 %v980_v48, %v1957_v37 }
 0x176   : > { %1087 = vst [vmem:[%s1963_s11 + $0x8] sm:$0xff] %v1055_v51  ;;  %v1057_v54 = vadd.f32 %v982_v52, %v1959_v40 }
 0x177   : > { %1088 = vst [vmem:[%s1963_s11 + $0x10] sm:$0xff] %v1056_v53  ;;  %v872_v55 = vpop.f32.mrb[4].mxu1 }
 0x178   : > { %1089 = vst [vmem:[%s1963_s11 + $0x18] sm:$0xff] %v1057_v54  ;;  %v985_v56 = vpop.f32.mrb[4].mxu0  ;;  %v874_v58 = vpop.f32.mrb[5].mxu1 }
 0x179   : > { %v986_v57 = vadd.f32 %v985_v56, %v872_v55  ;;  %v987_v59 = vpop.f32.mrb[5].mxu0  ;;  %v876_v61 = vpop.f32.mrb[6].mxu1 }
 0x17a   : > { %v988_v60 = vadd.f32 %v987_v59, %v874_v58  ;;  %v989_v62 = vpop.f32.mrb[6].mxu0  ;;  %v878_v1 = vpop.f32.mrb[7].mxu1 }
 0x17b   : > { %v1058_v63 = vadd.f32 %v986_v57, %v1957_v37  ;;  %v990_v0 = vadd.f32 %v989_v62, %v876_v61  ;;  %v991_v2 = vpop.f32.mrb[7].mxu0 }
 0x17c   : > { %v1059_v3 = vadd.f32 %v988_v60, %v1959_v40  ;;  %v992_v4 = vadd.f32 %v991_v2, %v878_v1 }
 0x17d   : > { %1090 = vst [vmem:[%s1963_s11 + $0x20] sm:$0xff] %v1058_v63  ;;  %v1060_v5 = vadd.f32 %v990_v0, %v1957_v37 }
 0x17e   : > { %1091 = vst [vmem:[%s1963_s11 + $0x28] sm:$0xff] %v1059_v3  ;;  %v1061_v6 = vadd.f32 %v992_v4, %v1959_v40 }
 0x17f   : > { %1092 = vst [vmem:[%s1963_s11 + $0x30] sm:$0xff] %v1060_v5  ;;  %v882_v7 = vpop.f32.mrb[8].mxu1 }
 0x180   : > { %1093 = vst [vmem:[%s1963_s11 + $0x38] sm:$0xff] %v1061_v6  ;;  %v995_v8 = vpop.f32.mrb[8].mxu0  ;;  %v884_v10 = vpop.f32.mrb[9].mxu1 }
 0x181   : > { %v996_v9 = vadd.f32 %v995_v8, %v882_v7  ;;  %v997_v11 = vpop.f32.mrb[9].mxu0  ;;  %v886_v13 = vpop.f32.mrb[10].mxu1 }
 0x182   : > { %v998_v12 = vadd.f32 %v997_v11, %v884_v10  ;;  %v999_v14 = vpop.f32.mrb[10].mxu0  ;;  %v888_v17 = vpop.f32.mrb[11].mxu1 }
 0x183   : > { %v1062_v15 = vadd.f32 %v996_v9, %v1957_v37  ;;  %v1000_v16 = vadd.f32 %v999_v14, %v886_v13  ;;  %v1001_v18 = vpop.f32.mrb[11].mxu0 }
 0x184   : > { %v1063_v19 = vadd.f32 %v998_v12, %v1959_v40  ;;  %v1002_v20 = vadd.f32 %v1001_v18, %v888_v17 }
 0x185   : > { %1094 = vst [vmem:[%s1963_s11 + $0x40] sm:$0xff] %v1062_v15  ;;  %v1064_v21 = vadd.f32 %v1000_v16, %v1957_v37 }
 0x186   : > { %1095 = vst [vmem:[%s1963_s11 + $0x48] sm:$0xff] %v1063_v19  ;;  %v1065_v22 = vadd.f32 %v1002_v20, %v1959_v40 }
 0x187   : > { %1096 = vst [vmem:[%s1963_s11 + $0x50] sm:$0xff] %v1064_v21  ;;  %v892_v23 = vpop.f32.mrb[12].mxu1 }
 0x188   : > { %1097 = vst [vmem:[%s1963_s11 + $0x58] sm:$0xff] %v1065_v22  ;;  %v1005_v24 = vpop.f32.mrb[12].mxu0  ;;  %v894_v26 = vpop.f32.mrb[13].mxu1 }
 0x189   : > { %v1006_v25 = vadd.f32 %v1005_v24, %v892_v23  ;;  %v1007_v27 = vpop.f32.mrb[13].mxu0  ;;  %v896_v29 = vpop.f32.mrb[14].mxu1 }
 0x18a   : > { %v1008_v28 = vadd.f32 %v1007_v27, %v894_v26  ;;  %v1009_v30 = vpop.f32.mrb[14].mxu0  ;;  %v898_v33 = vpop.f32.mrb[15].mxu1 }
 0x18b   : > { %v1066_v31 = vadd.f32 %v1006_v25, %v1957_v37  ;;  %v1010_v32 = vadd.f32 %v1009_v30, %v896_v29  ;;  %v1011_v34 = vpop.f32.mrb[15].mxu0 }
 0x18c   : > { %v1067_v35 = vadd.f32 %v1008_v28, %v1959_v40  ;;  %v1012_v36 = vadd.f32 %v1011_v34, %v898_v33 }
 0x18d   : > { %1098 = vst [vmem:[%s1963_s11 + $0x60] sm:$0xff] %v1066_v31  ;;  %v1068_v38 = vadd.f32 %v1010_v32, %v1957_v37 }
 0x18e   : > { %1099 = vst [vmem:[%s1963_s11 + $0x68] sm:$0xff] %v1067_v35  ;;  %v1069_v39 = vadd.f32 %v1012_v36, %v1959_v40 }
 0x18f   : > { %1100 = vst [vmem:[%s1963_s11 + $0x70] sm:$0xff] %v1068_v38  ;;  %v902_v41 = vpop.f32.mrb[16].mxu1 }
 0x190   : > { %1101 = vst [vmem:[%s1963_s11 + $0x78] sm:$0xff] %v1069_v39  ;;  %v1015_v42 = vpop.f32.mrb[16].mxu0  ;;  %v904_v44 = vpop.f32.mrb[17].mxu1 }
 0x191   : > { %v1016_v43 = vadd.f32 %v1015_v42, %v902_v41  ;;  %v1017_v45 = vpop.f32.mrb[17].mxu0  ;;  %v906_v47 = vpop.f32.mrb[18].mxu1 }
 0x192   : > { %v1018_v46 = vadd.f32 %v1017_v45, %v904_v44  ;;  %v1019_v48 = vpop.f32.mrb[18].mxu0  ;;  %v908_v51 = vpop.f32.mrb[19].mxu1 }
 0x193   : > { %v1070_v49 = vadd.f32 %v1016_v43, %v1957_v37  ;;  %v1020_v50 = vadd.f32 %v1019_v48, %v906_v47  ;;  %v1021_v52 = vpop.f32.mrb[19].mxu0 }
 0x194   : > { %v1071_v53 = vadd.f32 %v1018_v46, %v1959_v40  ;;  %v1022_v54 = vadd.f32 %v1021_v52, %v908_v51 }
 0x195   : > { %1102 = vst [vmem:[%s1963_s11 + $0x80] sm:$0xff] %v1070_v49  ;;  %v1072_v55 = vadd.f32 %v1020_v50, %v1957_v37 }
 0x196   : > { %1103 = vst [vmem:[%s1963_s11 + $0x88] sm:$0xff] %v1071_v53  ;;  %v1073_v56 = vadd.f32 %v1022_v54, %v1959_v40 }
 0x197   : > { %1104 = vst [vmem:[%s1963_s11 + $0x90] sm:$0xff] %v1072_v55  ;;  %v912_v57 = vpop.f32.mrb[20].mxu1 }
 0x198   : > { %1105 = vst [vmem:[%s1963_s11 + $0x98] sm:$0xff] %v1073_v56  ;;  %v1025_v58 = vpop.f32.mrb[20].mxu0  ;;  %v914_v60 = vpop.f32.mrb[21].mxu1 }
 0x199   : > { %v1026_v59 = vadd.f32 %v1025_v58, %v912_v57  ;;  %v1027_v61 = vpop.f32.mrb[21].mxu0  ;;  %v916_v63 = vpop.f32.mrb[22].mxu1 }
 0x19a   : > { %v1028_v62 = vadd.f32 %v1027_v61, %v914_v60  ;;  %v1029_v0 = vpop.f32.mrb[22].mxu0  ;;  %v918_v3 = vpop.f32.mrb[23].mxu1 }
 0x19b   : > { %v1074_v1 = vadd.f32 %v1026_v59, %v1957_v37  ;;  %v1030_v2 = vadd.f32 %v1029_v0, %v916_v63  ;;  %v1031_v4 = vpop.f32.mrb[23].mxu0 }
 0x19c   : > { %v1075_v5 = vadd.f32 %v1028_v62, %v1959_v40  ;;  %v1032_v6 = vadd.f32 %v1031_v4, %v918_v3 }
 0x19d   : > { %1106 = vst [vmem:[%s1963_s11 + $0xa0] sm:$0xff] %v1074_v1  ;;  %v1076_v7 = vadd.f32 %v1030_v2, %v1957_v37 }
 0x19e   : > { %1107 = vst [vmem:[%s1963_s11 + $0xa8] sm:$0xff] %v1075_v5  ;;  %v1077_v8 = vadd.f32 %v1032_v6, %v1959_v40 }
 0x19f   : > { %1108 = vst [vmem:[%s1963_s11 + $0xb0] sm:$0xff] %v1076_v7  ;;  %v922_v9 = vpop.f32.mrb[24].mxu1 }
 0x1a0   : > { %1109 = vst [vmem:[%s1963_s11 + $0xb8] sm:$0xff] %v1077_v8  ;;  %v1035_v10 = vpop.f32.mrb[24].mxu0  ;;  %v924_v12 = vpop.f32.mrb[25].mxu1 }
 0x1a1   : > { %v1036_v11 = vadd.f32 %v1035_v10, %v922_v9  ;;  %v1037_v13 = vpop.f32.mrb[25].mxu0  ;;  %v926_v15 = vpop.f32.mrb[26].mxu1 }
 0x1a2   : > { %v1038_v14 = vadd.f32 %v1037_v13, %v924_v12  ;;  %v1039_v16 = vpop.f32.mrb[26].mxu0  ;;  %v928_v19 = vpop.f32.mrb[27].mxu1 }
 0x1a3   : > { %v1078_v17 = vadd.f32 %v1036_v11, %v1957_v37  ;;  %v1040_v18 = vadd.f32 %v1039_v16, %v926_v15  ;;  %v1041_v20 = vpop.f32.mrb[27].mxu0 }
 0x1a4   : > { %v1079_v21 = vadd.f32 %v1038_v14, %v1959_v40  ;;  %v1042_v22 = vadd.f32 %v1041_v20, %v928_v19 }
 0x1a5   : > { %1110 = vst [vmem:[%s1963_s11 + $0xc0] sm:$0xff] %v1078_v17  ;;  %v1080_v23 = vadd.f32 %v1040_v18, %v1957_v37 }
 0x1a6   : > { %1111 = vst [vmem:[%s1963_s11 + $0xc8] sm:$0xff] %v1079_v21  ;;  %v1081_v24 = vadd.f32 %v1042_v22, %v1959_v40 }
 0x1a7   : > { %1112 = vst [vmem:[%s1963_s11 + $0xd0] sm:$0xff] %v1080_v23  ;;  %v932_v25 = vpop.f32.mrb[28].mxu1 }
 0x1a8   : > { %1113 = vst [vmem:[%s1963_s11 + $0xd8] sm:$0xff] %v1081_v24  ;;  %v1045_v26 = vpop.f32.mrb[28].mxu0  ;;  %v934_v28 = vpop.f32.mrb[29].mxu1 }
 0x1a9   : > { %v1046_v27 = vadd.f32 %v1045_v26, %v932_v25  ;;  %v1047_v29 = vpop.f32.mrb[29].mxu0  ;;  %v936_v31 = vpop.f32.mrb[30].mxu1 }
 0x1aa   : > { %v1048_v30 = vadd.f32 %v1047_v29, %v934_v28  ;;  %v1049_v32 = vpop.f32.mrb[30].mxu0  ;;  %v938_v35 = vpop.f32.mrb[31].mxu1 }
 0x1ab   : > { %v1082_v33 = vadd.f32 %v1046_v27, %v1957_v37  ;;  %v1050_v34 = vadd.f32 %v1049_v32, %v936_v31  ;;  %v1051_v36 = vpop.f32.mrb[31].mxu0 }
 0x1ac   : > { %v1083_v38 = vadd.f32 %v1048_v30, %v1959_v40  ;;  %v1052_v39 = vadd.f32 %v1051_v36, %v938_v35 }
 0x1ad   : > { %1114 = vst [vmem:[%s1963_s11 + $0xe0] sm:$0xff] %v1082_v33  ;;  %v1084_v41 = vadd.f32 %v1050_v34, %v1957_v37 }
 0x1ae   : > { %1115 = vst [vmem:[%s1963_s11 + $0xe8] sm:$0xff] %v1083_v38  ;;  %v1085_v42 = vadd.f32 %v1052_v39, %v1959_v40 }
 0x1af   : > { %1116 = vst [vmem:[%s1963_s11 + $0xf0] sm:$0xff] %v1084_v41 }
 0x1b0   : > { %1117 = vst [vmem:[%s1963_s11 + $0xf8] sm:$0xff] %v1085_v42 }
 0x1b1   : > { %1615 = shalt.err (!%p1612_p0)
}
 0x1b2   : > { %s1616_s4 = scalar_lea.hbm %s2026_s15, 4096  ;;  %s1620_s25 = scalar_lea.hbm %s2086_s3, 8192 }
 0x1b3   : > { %p1617_p2 = scmp.ne.s32.totalorder %s2026_s15, %s1616_s4  ;;  %p1621_p5 = scmp.lt.u32.totalorder %s2026_s15, %s2086_s3 }
 0x1b4   : > { %p1622_p8 = scmp.lt.u32.totalorder %s1620_s25, %s1616_s4  ;;  %p1624_p11 = scmp.lt.u32.totalorder %s1616_s4, %s2026_s15 }
 0x1b5   : > { %p1618_p7 = pnand %p1617_p2, %p2105_p13 }
 0x1b6   : > { %p1623_p9 = por %p1622_p8, %p1621_p5 }
 0x1b7   : > { %p1619_p12 = pneg %p1618_p7 }
 0x1b8   : > { %p1625_p4 = por %p1624_p11, %p1623_p9 }
 0x1ba   : > { %p1626_p1 = pnand %p1625_p4, %p1619_p12 }
 0x1bc   : > { %1629 = shalt.err (!%p1626_p1)
}
 0x1bd   : > { %s1698_s11 = smov 256   ;;  %s1699_s19 = smov 512  }
 0x1be   : > { %s1700_s10 = smov 16  }
 0x1bf   : > { %1373 = dma.vmem_to_hbm [thread:$0]  (%p2105_p13), %s2030_s5, 4096, %s2026_s15, %s1119_s21, %s1698_s11, %s1699_s19, %s1700_s10  }
 0x1c0 PF: > { %s1150_s27 = sand.u32 1, %s1668_s12   ;;  %p2106_p10 = scmp.ne.s32.totalorder %s2097_s24, 0 }
 0x1c1   : > { %p2107_p3 = scmp.ge.s32.totalorder %s1688_s17, 2  ;;  %s1151_s26 = scalar_lea.sflag [#allocation4], %s1150_s27 }
 0x1c3   : > { %p1384_p6 = pnand %p2107_p3, %p2106_p10 }
 0x1c5   : > { %1663 = dma.done.wait (!%p1384_p6), %s1151_s26, 4096  }
 0x1c6   : > { %1665 = vsyncadd (!%p1384_p6), %s1151_s26, 4294963200  ;;  %s20_s17 = sadd.s32 1, %s1688_s17   ;;  %s2108_s12 = smov %s1672_s13 }
 0x1c7   : > { %p17_p0 = scmp.ge.s32.totalorder %s20_s17, 4   ;;  %s2109_s13 = smov %s1676_s14 }
 0x1c8   : > { %s2110_s14 = smov %s1839_s18  ;;  %s2111_s15 = smov %s1684_s16 }
 0x1c9   : > { %s2112_s16 = smov %s2114_s30  ;;  %19 = sbr.rel (!%p17_p0) target bundleno = 7 (0x7), region = 90 }
 0x1d0   :  { %1156 = vsyncpa [#allocation3], 1 }
 0x1d1   :  { %1158 = vsyncpa [#allocation3 + $0x1], 1 }
 0x1d2   :  { %1159 = vsyncpa [#allocation6], 1 }
 0x1d3   :  { %1161 = vsyncpa [#allocation6 + $0x1], 1 }
 0x1d4   :  { %1162 = vsyncpa [#allocation4], 1 }
 0x1d5   :  { %1164 = vsyncpa [#allocation4 + $0x1], 1 }

</bundles_post_ra>
